<compile_context>
chip_gen: v6e
topology: v6e:2x2x1
jax: 0.10.0
libtpu: 0.0.40
codegen_flags: <defaults>
</compile_context>

<pallas_src>
import functools

import jax
import jax.numpy as jnp
from jax.experimental import pallas as pl
from jax.experimental.pallas import tpu as pltpu


_MAX_OFF = 9    # largest conv reach: k=7, dilation=3 -> +/- 9 taps


# ----------------------------------------------------------------------------
# Scalar-parameter packing: one flat (18*C + 32,) f32 vector living in SMEM.
# ----------------------------------------------------------------------------
def _offsets(C):
    return {
        "W0": 0,            # C*5 : depthwise conv0 taps (k=5), index c*5+k
        "B0": 5 * C,        # C   : conv0 bias
        "WS": 6 * C,        # C*7 : dilated depthwise taps (k=7,d=3), c*7+k
        "BS": 13 * C,       # C   : dilated conv bias
        "W1": 14 * C,       # C   : conv1 (1x1, C->1) weights
        "W2": 15 * C,       # C   : conv2 (1x1, C->1) weights
        "WF": 16 * C,       # C   : expand conv (1->C) weights
        "BF": 17 * C,       # C   : expand conv bias
        "B1": 18 * C,       # 1   : conv1 bias
        "B2": 18 * C + 1,   # 1   : conv2 bias
        "WSQ": 18 * C + 2,  # 28  : conv_squeeze taps, index (o*2+i)*7+k
        "BSQ": 18 * C + 30,  # 2  : conv_squeeze bias
        "TOTAL": 18 * C + 32,
    }


def _pack_scalars(p, C):
    parts = [
        jnp.asarray(p["w0"], jnp.float32).reshape(C, 5).reshape(-1),   # W0
        jnp.asarray(p["b0"], jnp.float32).reshape(C),                  # B0
        jnp.asarray(p["ws"], jnp.float32).reshape(C, 7).reshape(-1),   # WS
        jnp.asarray(p["bs"], jnp.float32).reshape(C),                  # BS
        jnp.asarray(p["w1"], jnp.float32).reshape(C),                  # W1
        jnp.asarray(p["w2"], jnp.float32).reshape(C),                  # W2
        jnp.asarray(p["wf"], jnp.float32).reshape(C),                  # WF
        jnp.asarray(p["bf"], jnp.float32).reshape(C),                  # BF
        jnp.asarray(p["b1"], jnp.float32).reshape(1),                  # B1
        jnp.asarray(p["b2"], jnp.float32).reshape(1),                  # B2
        jnp.asarray(p["wsq"], jnp.float32).reshape(-1),                # WSQ
        jnp.asarray(p["bsq"], jnp.float32).reshape(2),                 # BSQ
    ]
    scal = jnp.concatenate(parts)
    assert scal.shape == (_offsets(C)["TOTAL"],)
    return scal


# ----------------------------------------------------------------------------
# Pallas kernel: LSKblock1D + residual for one block of nb batch elements.
# Block layout: rows = channel-major (c*nb + i), lanes = time padded to Tp.
# Zero padding (lanes >= T) + Tp >= T + 9 means every pltpu.roll wrap-around
# reads zeros, exactly reproducing the zero-padded convolutions.
# ----------------------------------------------------------------------------
def _lsk_residual_kernel(x_ref, s_ref, o_ref, *, nb, C, T):
    Tp = x_ref.shape[-1]
    off = _offsets(C)

    # trace-time-constant lane-validity mask (hoisted, reused C + 2 times)
    lane_valid = jax.lax.broadcasted_iota(jnp.int32, (nb, Tp), 1) < T

    def s(i):                       # scalar weight from SMEM (splats free in VPU ops)
        return s_ref[i]

    def shift(v, d):                # out[:, t] = v[:, t + d]
        if d == 0:
            return v
        return pltpu.roll(v, shift=(-d) % Tp, axis=1)

    a1 = None
    a2 = None
    xs = []
    for c in range(C):
        xc = x_ref[c * nb:(c + 1) * nb, :]          # vreg-aligned row slice
        xs.append(xc)

        # --- conv0: depthwise Conv1d(C, C, k=5, pad=2, groups=C) -------------
        acc1 = s(off["B0"] + c) + s(off["W0"] + 5 * c) * shift(xc, -2)
        for kk in range(1, 5):
            acc1 = acc1 + s(off["W0"] + 5 * c + kk) * shift(xc, kk - 2)
        acc1 = jnp.where(lane_valid, acc1, 0.0)     # re-zero padding before reuse

        # --- conv_spatial: depthwise Conv1d(C, C, k=7, pad=9, dil=3) ---------
        acc2 = s(off["BS"] + c) + s(off["WS"] + 7 * c) * shift(acc1, -9)
        for kk in range(1, 7):
            acc2 = acc2 + s(off["WS"] + 7 * c + kk) * shift(acc1, 3 * kk - 9)

        # --- conv1 / conv2: 1x1 convs, contract over channels (C -> 1) -------
        t1 = s(off["W1"] + c) * acc1
        t2 = s(off["W2"] + c) * acc2
        a1 = t1 if a1 is None else a1 + t1
        a2 = t2 if a2 is None else a2 + t2

    a1 = jnp.where(lane_valid, a1 + s(off["B1"]), 0.0)   # (nb, Tp)
    a2 = jnp.where(lane_valid, a2 + s(off["B2"]), 0.0)   # (nb, Tp)

    # --- channel mean / max ---------------------------------------------------
    avg = 0.5 * (a1 + a2)
    mx = jnp.maximum(a1, a2)

    # --- conv_squeeze: Conv1d(2, 2, k=7, pad=3) + sigmoid ----------------------
    z0 = None
    z1 = None
    for kk in range(7):
        sa = shift(avg, kk - 3)
        sm = shift(mx, kk - 3)
        c0 = s(off["WSQ"] + 0 * 7 + kk) * sa + s(off["WSQ"] + 1 * 7 + kk) * sm
        c1 = s(off["WSQ"] + 2 * 7 + kk) * sa + s(off["WSQ"] + 3 * 7 + kk) * sm
        z0 = c0 if z0 is None else z0 + c0
        z1 = c1 if z1 is None else z1 + c1
    sig0 = jax.nn.sigmoid(z0 + s(off["BSQ"] + 0))
    sig1 = jax.nn.sigmoid(z1 + s(off["BSQ"] + 1))

    gated = a1 * sig0 + a2 * sig1                   # (nb, Tp)

    # --- 1x1 expand back to C channels, gate, residual (per-channel stores) ---
    for c in range(C):
        attn_c = s(off["WF"] + c) * gated + s(off["BF"] + c)
        o_ref[c * nb:(c + 1) * nb, :] = (xs[c] * (1.0 + attn_c)).astype(o_ref.dtype)


# ----------------------------------------------------------------------------
# Wrapper-side helpers
# ----------------------------------------------------------------------------
def _round_up(a, m):
    return ((a + m - 1) // m) * m


def _choose_tiling(N, C, Tp):
    # G = 1 (fold whole batch into sublanes) unless VMEM forces tiling:
    # v5e/v6e have a single TensorCore (grid is a serial loop), and on v7x the
    # body is too small to amortize a megacore split at small N.  nb is a
    # multiple of 8 so every per-channel row slice is vreg-aligned (f32
    # sublanes = 8) and 2*nb / C*nb are multiples of 8 too.
    # VMEM budget: ~ (4*C + 8) live (nb, Tp) f32 temps + 2x double-buffered
    # input/output blocks of (C*nb, Tp) f32  ->  (8*C + 16) * nb * Tp * 4 B.
    per_nb_bytes = (8 * C + 16) * Tp * 4
    budget = 20 * 1024 * 1024                  # headroom under the 32 MiB scoped limit
    max_nb = max(8, (budget // per_nb_bytes) // 8 * 8)
    nb = min(_round_up(N, 8), max_nb)
    G = pl.cdiv(N, nb)
    return nb, G


# ----------------------------------------------------------------------------
# Forward wrapper
# ----------------------------------------------------------------------------
def mtad_gat_forward(x_ntc, p):
    """x_ntc: (N, T, C) float32.  Returns (pred, recon) (both == h_end trunk)."""
    x_ntc = jnp.asarray(x_ntc, jnp.float32)
    N, T, C = x_ntc.shape

    Tp = 128 * pl.cdiv(T + _MAX_OFF, 128)        # lane-dense + room for roll wrap
    assert T + _MAX_OFF <= Tp                    # roll wrap-around hits zero padding

    nb, G = _choose_tiling(N, C, Tp)
    Ng = G * nb
    R = C * nb

    # layout prep (fused under jit): (N,T,C) -> (G, C*nb, Tp), channel-major
    # rows, zero padding on the batch tail and on lanes >= T.
    xb = jnp.pad(x_ntc, ((0, Ng - N), (0, Tp - T), (0, 0)))      # (Ng, Tp, C)
    xb = xb.reshape(G, nb, Tp, C).transpose(0, 3, 1, 2)          # (G, C, nb, Tp)
    xb = xb.reshape(G, R, Tp)

    scal = _pack_scalars(p, C)                                   # (18C+32,) SMEM

    kernel = functools.partial(_lsk_residual_kernel, nb=nb, C=C, T=T)

    h = pl.pallas_call(
        kernel,
        out_shape=jax.ShapeDtypeStruct((G, R, Tp), jnp.float32),
        grid=(G,),
        in_specs=[
            pl.BlockSpec((None, R, Tp), lambda g: (g, 0, 0)),          # x block
            pl.BlockSpec(memory_space=pltpu.MemorySpace.SMEM),         # scalar weights
        ],
        out_specs=pl.BlockSpec((None, R, Tp), lambda g: (g, 0, 0)),
        compiler_params=pltpu.CompilerParams(
            dimension_semantics=("parallel",),          # only matters when G > 1
            vmem_limit_bytes=32 * 1024 * 1024,
        ),
    )(xb, scal)

    # back to module layout (N, T, C)
    h = h.reshape(G, C, nb, Tp).transpose(0, 2, 3, 1).reshape(Ng, Tp, C)
    h_ntc = h[:N, :T, :]

    # TODO(synk): pred_model (TCN_PRED) and recon_model (TCN_AE) were not
    # provided; both heads pass through the shared trunk h_end.
    pred = h_ntc
    recon = h_ntc
    return pred, recon


# ----------------------------------------------------------------------------
# Pure-JAX reference (lax.conv) used only to validate the kernel numerics
# ----------------------------------------------------------------------------
def _lsk_residual_ref(x_nct, p):
    dn = ("NCH", "OIH", "NCH")

    def conv(x, w, b, pad, dil=1, groups=1):
        y = jax.lax.conv_general_dilated(
            x, w, window_strides=(1,), padding=[(pad, pad)],
            rhs_dilation=(dil,), dimension_numbers=dn,
            feature_group_count=groups)
        return y + b[None, :, None]

    attn1 = conv(x_nct, p["w0"], p["b0"], pad=2, dil=1, groups=3)
    attn2 = conv(attn1, p["ws"], p["bs"], pad=9, dil=3, groups=3)
    a1 = conv(attn1, p["w1"], p["b1"], pad=0)
    a2 = conv(attn2, p["w2"], p["b2"], pad=0)
    attn = jnp.concatenate([a1, a2], axis=1)
    avg = jnp.mean(attn, axis=1, keepdims=True)
    mx = jnp.max(attn, axis=1, keepdims=True)
    agg = jnp.concatenate([avg, mx], axis=1)
    sig = jax.nn.sigmoid(conv(agg, p["wsq"], p["bsq"], pad=3))
    gated = a1 * sig[:, 0:1] + a2 * sig[:, 1:2]
    gated = conv(gated, p["wf"], p["bf"], pad=0)
    return x_nct + x_nct * gated                                # h_end (N, C, T)


def init_params(key):
    ks = jax.random.split(key, 12)

    def w(k, shape, scale=0.3):
        return scale * jax.random.normal(k, shape, dtype=jnp.float32)

    return {
        "w0": w(ks[0], (3, 1, 5)),  "b0": w(ks[1], (3,), 0.1),
        "ws": w(ks[2], (3, 1, 7)),  "bs": w(ks[3], (3,), 0.1),
        "w1": w(ks[4], (1, 3, 1)),  "b1": w(ks[5], (1,), 0.1),
        "w2": w(ks[6], (1, 3, 1)),  "b2": w(ks[7], (1,), 0.1),
        "wsq": w(ks[8], (2, 2, 7)), "bsq": w(ks[9], (2,), 0.1),
        "wf": w(ks[10], (3, 1, 1)), "bf": w(ks[11], (3,), 0.1),
    }


if __name__ == "__main__":
    key = jax.random.PRNGKey(0)
    kx, kp = jax.random.split(key)

    N, T, C = 2, 48, 3          # window_size=49, next_steps=1 -> T=48; n_features=3
    x = jax.random.normal(kx, (N, T, C), dtype=jnp.float32)
    params = init_params(kp)

    fwd = jax.jit(mtad_gat_forward)
    pred, recon = fwd(x, params)
    jax.block_until_ready((pred, recon))

    # validate the Pallas LSK trunk against the lax.conv reference
    h_ref = jnp.transpose(
        _lsk_residual_ref(jnp.transpose(x, (0, 2, 1)), params), (0, 2, 1))
    assert pred.shape == (N, T, C) and recon.shape == (N, T, C)
    assert jnp.allclose(recon, h_ref, atol=1e-4, rtol=1e-4), "mismatch vs reference"

    print("KERNEL_OK")
</pallas_src>

<mosaic_0001>
module attributes {stable_mosaic.version = 11 : i64} {
  func.func @_lsk_residual_kernel(%arg0: i32, %arg1: memref<1x24x128xf32, #tpu.memory_space<vmem>>, %arg2: memref<86xf32, #tpu.memory_space<smem>>, %arg3: memref<1x24x128xf32, #tpu.memory_space<vmem>>) attributes {dimension_semantics = [#tpu.dimension_semantics<parallel>], iteration_bounds = array<i64: 1>, scalar_prefetch = 0 : i64, scratch_operands = 0 : i64, tpu.core_type = #tpu.core_type<tc>, window_params = [{transform_indices = @transform_0, window_bounds = array<i64: 1, 24, 128>}, {transform_indices = @transform_1, window_bounds = array<i64: 86>}, {transform_indices = @transform_2, window_bounds = array<i64: 1, 24, 128>}]} {
    %0 = tpu.iota {dimensions = array<i32: 1>} : vector<8x128xi32>
    %c48_i32 = arith.constant 48 : i32
    %1 = vector.broadcast %c48_i32 : i32 to vector<8x128xi32>
    %2 = arith.cmpi slt, %0, %1 : vector<8x128xi32>
    %c0 = arith.constant 0 : index
    %c0_0 = arith.constant 0 : index
    %c0_1 = arith.constant 0 : index
    %3 = vector.load %arg1[%c0, %c0_0, %c0_1] : memref<1x24x128xf32, #tpu.memory_space<vmem>>, vector<1x8x128xf32>
    %4 = vector.shape_cast %3 : vector<1x8x128xf32> to vector<8x128xf32>
    %c15 = arith.constant 15 : index
    %5 = memref.load %arg2[%c15] : memref<86xf32, #tpu.memory_space<smem>>
    %c0_2 = arith.constant 0 : index
    %6 = memref.load %arg2[%c0_2] : memref<86xf32, #tpu.memory_space<smem>>
    %c2_i32 = arith.constant 2 : i32
    %7 = tpu.dynamic_rotate %4 by %c2_i32 dim 1 : vector<8x128xf32>, i32 -> vector<8x128xf32>
    %8 = vector.broadcast %6 : f32 to vector<8x128xf32>
    %9 = arith.mulf %8, %7 : vector<8x128xf32>
    %10 = vector.broadcast %5 : f32 to vector<8x128xf32>
    %11 = arith.addf %10, %9 : vector<8x128xf32>
    %c1 = arith.constant 1 : index
    %12 = memref.load %arg2[%c1] : memref<86xf32, #tpu.memory_space<smem>>
    %c1_i32 = arith.constant 1 : i32
    %13 = tpu.dynamic_rotate %4 by %c1_i32 dim 1 : vector<8x128xf32>, i32 -> vector<8x128xf32>
    %14 = vector.broadcast %12 : f32 to vector<8x128xf32>
    %15 = arith.mulf %14, %13 : vector<8x128xf32>
    %16 = arith.addf %11, %15 : vector<8x128xf32>
    %c2 = arith.constant 2 : index
    %17 = memref.load %arg2[%c2] : memref<86xf32, #tpu.memory_space<smem>>
    %18 = vector.broadcast %17 : f32 to vector<8x128xf32>
    %19 = arith.mulf %18, %4 : vector<8x128xf32>
    %20 = arith.addf %16, %19 : vector<8x128xf32>
    %c3 = arith.constant 3 : index
    %21 = memref.load %arg2[%c3] : memref<86xf32, #tpu.memory_space<smem>>
    %c127_i32 = arith.constant 127 : i32
    %22 = tpu.dynamic_rotate %4 by %c127_i32 dim 1 : vector<8x128xf32>, i32 -> vector<8x128xf32>
    %23 = vector.broadcast %21 : f32 to vector<8x128xf32>
    %24 = arith.mulf %23, %22 : vector<8x128xf32>
    %25 = arith.addf %20, %24 : vector<8x128xf32>
    %c4 = arith.constant 4 : index
    %26 = memref.load %arg2[%c4] : memref<86xf32, #tpu.memory_space<smem>>
    %c126_i32 = arith.constant 126 : i32
    %27 = tpu.dynamic_rotate %4 by %c126_i32 dim 1 : vector<8x128xf32>, i32 -> vector<8x128xf32>
    %28 = vector.broadcast %26 : f32 to vector<8x128xf32>
    %29 = arith.mulf %28, %27 : vector<8x128xf32>
    %30 = arith.addf %25, %29 : vector<8x128xf32>
    %cst = arith.constant 0.000000e+00 : f32
    %31 = vector.broadcast %cst : f32 to vector<8x128xf32>
    %32 = arith.select %2, %30, %31 : vector<8x128xi1>, vector<8x128xf32>
    %c39 = arith.constant 39 : index
    %33 = memref.load %arg2[%c39] : memref<86xf32, #tpu.memory_space<smem>>
    %c18 = arith.constant 18 : index
    %34 = memref.load %arg2[%c18] : memref<86xf32, #tpu.memory_space<smem>>
    %c9_i32 = arith.constant 9 : i32
    %35 = tpu.dynamic_rotate %32 by %c9_i32 dim 1 : vector<8x128xf32>, i32 -> vector<8x128xf32>
    %36 = vector.broadcast %34 : f32 to vector<8x128xf32>
    %37 = arith.mulf %36, %35 : vector<8x128xf32>
    %38 = vector.broadcast %33 : f32 to vector<8x128xf32>
    %39 = arith.addf %38, %37 : vector<8x128xf32>
    %c19 = arith.constant 19 : index
    %40 = memref.load %arg2[%c19] : memref<86xf32, #tpu.memory_space<smem>>
    %c6_i32 = arith.constant 6 : i32
    %41 = tpu.dynamic_rotate %32 by %c6_i32 dim 1 : vector<8x128xf32>, i32 -> vector<8x128xf32>
    %42 = vector.broadcast %40 : f32 to vector<8x128xf32>
    %43 = arith.mulf %42, %41 : vector<8x128xf32>
    %44 = arith.addf %39, %43 : vector<8x128xf32>
    %c20 = arith.constant 20 : index
    %45 = memref.load %arg2[%c20] : memref<86xf32, #tpu.memory_space<smem>>
    %c3_i32 = arith.constant 3 : i32
    %46 = tpu.dynamic_rotate %32 by %c3_i32 dim 1 : vector<8x128xf32>, i32 -> vector<8x128xf32>
    %47 = vector.broadcast %45 : f32 to vector<8x128xf32>
    %48 = arith.mulf %47, %46 : vector<8x128xf32>
    %49 = arith.addf %44, %48 : vector<8x128xf32>
    %c21 = arith.constant 21 : index
    %50 = memref.load %arg2[%c21] : memref<86xf32, #tpu.memory_space<smem>>
    %51 = vector.broadcast %50 : f32 to vector<8x128xf32>
    %52 = arith.mulf %51, %32 : vector<8x128xf32>
    %53 = arith.addf %49, %52 : vector<8x128xf32>
    %c22 = arith.constant 22 : index
    %54 = memref.load %arg2[%c22] : memref<86xf32, #tpu.memory_space<smem>>
    %c125_i32 = arith.constant 125 : i32
    %55 = tpu.dynamic_rotate %32 by %c125_i32 dim 1 : vector<8x128xf32>, i32 -> vector<8x128xf32>
    %56 = vector.broadcast %54 : f32 to vector<8x128xf32>
    %57 = arith.mulf %56, %55 : vector<8x128xf32>
    %58 = arith.addf %53, %57 : vector<8x128xf32>
    %c23 = arith.constant 23 : index
    %59 = memref.load %arg2[%c23] : memref<86xf32, #tpu.memory_space<smem>>
    %c122_i32 = arith.constant 122 : i32
    %60 = tpu.dynamic_rotate %32 by %c122_i32 dim 1 : vector<8x128xf32>, i32 -> vector<8x128xf32>
    %61 = vector.broadcast %59 : f32 to vector<8x128xf32>
    %62 = arith.mulf %61, %60 : vector<8x128xf32>
    %63 = arith.addf %58, %62 : vector<8x128xf32>
    %c24 = arith.constant 24 : index
    %64 = memref.load %arg2[%c24] : memref<86xf32, #tpu.memory_space<smem>>
    %c119_i32 = arith.constant 119 : i32
    %65 = tpu.dynamic_rotate %32 by %c119_i32 dim 1 : vector<8x128xf32>, i32 -> vector<8x128xf32>
    %66 = vector.broadcast %64 : f32 to vector<8x128xf32>
    %67 = arith.mulf %66, %65 : vector<8x128xf32>
    %68 = arith.addf %63, %67 : vector<8x128xf32>
    %c42 = arith.constant 42 : index
    %69 = memref.load %arg2[%c42] : memref<86xf32, #tpu.memory_space<smem>>
    %70 = vector.broadcast %69 : f32 to vector<8x128xf32>
    %71 = arith.mulf %70, %32 : vector<8x128xf32>
    %c45 = arith.constant 45 : index
    %72 = memref.load %arg2[%c45] : memref<86xf32, #tpu.memory_space<smem>>
    %73 = vector.broadcast %72 : f32 to vector<8x128xf32>
    %74 = arith.mulf %73, %68 : vector<8x128xf32>
    %c0_3 = arith.constant 0 : index
    %c8 = arith.constant 8 : index
    %c0_4 = arith.constant 0 : index
    %75 = vector.load %arg1[%c0_3, %c8, %c0_4] : memref<1x24x128xf32, #tpu.memory_space<vmem>>, vector<1x8x128xf32>
    %76 = vector.shape_cast %75 : vector<1x8x128xf32> to vector<8x128xf32>
    %c16 = arith.constant 16 : index
    %77 = memref.load %arg2[%c16] : memref<86xf32, #tpu.memory_space<smem>>
    %c5 = arith.constant 5 : index
    %78 = memref.load %arg2[%c5] : memref<86xf32, #tpu.memory_space<smem>>
    %c2_i32_5 = arith.constant 2 : i32
    %79 = tpu.dynamic_rotate %76 by %c2_i32_5 dim 1 : vector<8x128xf32>, i32 -> vector<8x128xf32>
    %80 = vector.broadcast %78 : f32 to vector<8x128xf32>
    %81 = arith.mulf %80, %79 : vector<8x128xf32>
    %82 = vector.broadcast %77 : f32 to vector<8x128xf32>
    %83 = arith.addf %82, %81 : vector<8x128xf32>
    %c6 = arith.constant 6 : index
    %84 = memref.load %arg2[%c6] : memref<86xf32, #tpu.memory_space<smem>>
    %c1_i32_6 = arith.constant 1 : i32
    %85 = tpu.dynamic_rotate %76 by %c1_i32_6 dim 1 : vector<8x128xf32>, i32 -> vector<8x128xf32>
    %86 = vector.broadcast %84 : f32 to vector<8x128xf32>
    %87 = arith.mulf %86, %85 : vector<8x128xf32>
    %88 = arith.addf %83, %87 : vector<8x128xf32>
    %c7 = arith.constant 7 : index
    %89 = memref.load %arg2[%c7] : memref<86xf32, #tpu.memory_space<smem>>
    %90 = vector.broadcast %89 : f32 to vector<8x128xf32>
    %91 = arith.mulf %90, %76 : vector<8x128xf32>
    %92 = arith.addf %88, %91 : vector<8x128xf32>
    %c8_7 = arith.constant 8 : index
    %93 = memref.load %arg2[%c8_7] : memref<86xf32, #tpu.memory_space<smem>>
    %c127_i32_8 = arith.constant 127 : i32
    %94 = tpu.dynamic_rotate %76 by %c127_i32_8 dim 1 : vector<8x128xf32>, i32 -> vector<8x128xf32>
    %95 = vector.broadcast %93 : f32 to vector<8x128xf32>
    %96 = arith.mulf %95, %94 : vector<8x128xf32>
    %97 = arith.addf %92, %96 : vector<8x128xf32>
    %c9 = arith.constant 9 : index
    %98 = memref.load %arg2[%c9] : memref<86xf32, #tpu.memory_space<smem>>
    %c126_i32_9 = arith.constant 126 : i32
    %99 = tpu.dynamic_rotate %76 by %c126_i32_9 dim 1 : vector<8x128xf32>, i32 -> vector<8x128xf32>
    %100 = vector.broadcast %98 : f32 to vector<8x128xf32>
    %101 = arith.mulf %100, %99 : vector<8x128xf32>
    %102 = arith.addf %97, %101 : vector<8x128xf32>
    %cst_10 = arith.constant 0.000000e+00 : f32
    %103 = vector.broadcast %cst_10 : f32 to vector<8x128xf32>
    %104 = arith.select %2, %102, %103 : vector<8x128xi1>, vector<8x128xf32>
    %c40 = arith.constant 40 : index
    %105 = memref.load %arg2[%c40] : memref<86xf32, #tpu.memory_space<smem>>
    %c25 = arith.constant 25 : index
    %106 = memref.load %arg2[%c25] : memref<86xf32, #tpu.memory_space<smem>>
    %c9_i32_11 = arith.constant 9 : i32
    %107 = tpu.dynamic_rotate %104 by %c9_i32_11 dim 1 : vector<8x128xf32>, i32 -> vector<8x128xf32>
    %108 = vector.broadcast %106 : f32 to vector<8x128xf32>
    %109 = arith.mulf %108, %107 : vector<8x128xf32>
    %110 = vector.broadcast %105 : f32 to vector<8x128xf32>
    %111 = arith.addf %110, %109 : vector<8x128xf32>
    %c26 = arith.constant 26 : index
    %112 = memref.load %arg2[%c26] : memref<86xf32, #tpu.memory_space<smem>>
    %c6_i32_12 = arith.constant 6 : i32
    %113 = tpu.dynamic_rotate %104 by %c6_i32_12 dim 1 : vector<8x128xf32>, i32 -> vector<8x128xf32>
    %114 = vector.broadcast %112 : f32 to vector<8x128xf32>
    %115 = arith.mulf %114, %113 : vector<8x128xf32>
    %116 = arith.addf %111, %115 : vector<8x128xf32>
    %c27 = arith.constant 27 : index
    %117 = memref.load %arg2[%c27] : memref<86xf32, #tpu.memory_space<smem>>
    %c3_i32_13 = arith.constant 3 : i32
    %118 = tpu.dynamic_rotate %104 by %c3_i32_13 dim 1 : vector<8x128xf32>, i32 -> vector<8x128xf32>
    %119 = vector.broadcast %117 : f32 to vector<8x128xf32>
    %120 = arith.mulf %119, %118 : vector<8x128xf32>
    %121 = arith.addf %116, %120 : vector<8x128xf32>
    %c28 = arith.constant 28 : index
    %122 = memref.load %arg2[%c28] : memref<86xf32, #tpu.memory_space<smem>>
    %123 = vector.broadcast %122 : f32 to vector<8x128xf32>
    %124 = arith.mulf %123, %104 : vector<8x128xf32>
    %125 = arith.addf %121, %124 : vector<8x128xf32>
    %c29 = arith.constant 29 : index
    %126 = memref.load %arg2[%c29] : memref<86xf32, #tpu.memory_space<smem>>
    %c125_i32_14 = arith.constant 125 : i32
    %127 = tpu.dynamic_rotate %104 by %c125_i32_14 dim 1 : vector<8x128xf32>, i32 -> vector<8x128xf32>
    %128 = vector.broadcast %126 : f32 to vector<8x128xf32>
    %129 = arith.mulf %128, %127 : vector<8x128xf32>
    %130 = arith.addf %125, %129 : vector<8x128xf32>
    %c30 = arith.constant 30 : index
    %131 = memref.load %arg2[%c30] : memref<86xf32, #tpu.memory_space<smem>>
    %c122_i32_15 = arith.constant 122 : i32
    %132 = tpu.dynamic_rotate %104 by %c122_i32_15 dim 1 : vector<8x128xf32>, i32 -> vector<8x128xf32>
    %133 = vector.broadcast %131 : f32 to vector<8x128xf32>
    %134 = arith.mulf %133, %132 : vector<8x128xf32>
    %135 = arith.addf %130, %134 : vector<8x128xf32>
    %c31 = arith.constant 31 : index
    %136 = memref.load %arg2[%c31] : memref<86xf32, #tpu.memory_space<smem>>
    %c119_i32_16 = arith.constant 119 : i32
    %137 = tpu.dynamic_rotate %104 by %c119_i32_16 dim 1 : vector<8x128xf32>, i32 -> vector<8x128xf32>
    %138 = vector.broadcast %136 : f32 to vector<8x128xf32>
    %139 = arith.mulf %138, %137 : vector<8x128xf32>
    %140 = arith.addf %135, %139 : vector<8x128xf32>
    %c43 = arith.constant 43 : index
    %141 = memref.load %arg2[%c43] : memref<86xf32, #tpu.memory_space<smem>>
    %142 = vector.broadcast %141 : f32 to vector<8x128xf32>
    %143 = arith.mulf %142, %104 : vector<8x128xf32>
    %c46 = arith.constant 46 : index
    %144 = memref.load %arg2[%c46] : memref<86xf32, #tpu.memory_space<smem>>
    %145 = vector.broadcast %144 : f32 to vector<8x128xf32>
    %146 = arith.mulf %145, %140 : vector<8x128xf32>
    %147 = arith.addf %71, %143 : vector<8x128xf32>
    %148 = arith.addf %74, %146 : vector<8x128xf32>
    %c0_17 = arith.constant 0 : index
    %c16_18 = arith.constant 16 : index
    %c0_19 = arith.constant 0 : index
    %149 = vector.load %arg1[%c0_17, %c16_18, %c0_19] : memref<1x24x128xf32, #tpu.memory_space<vmem>>, vector<1x8x128xf32>
    %150 = vector.shape_cast %149 : vector<1x8x128xf32> to vector<8x128xf32>
    %c17 = arith.constant 17 : index
    %151 = memref.load %arg2[%c17] : memref<86xf32, #tpu.memory_space<smem>>
    %c10 = arith.constant 10 : index
    %152 = memref.load %arg2[%c10] : memref<86xf32, #tpu.memory_space<smem>>
    %c2_i32_20 = arith.constant 2 : i32
    %153 = tpu.dynamic_rotate %150 by %c2_i32_20 dim 1 : vector<8x128xf32>, i32 -> vector<8x128xf32>
    %154 = vector.broadcast %152 : f32 to vector<8x128xf32>
    %155 = arith.mulf %154, %153 : vector<8x128xf32>
    %156 = vector.broadcast %151 : f32 to vector<8x128xf32>
    %157 = arith.addf %156, %155 : vector<8x128xf32>
    %c11 = arith.constant 11 : index
    %158 = memref.load %arg2[%c11] : memref<86xf32, #tpu.memory_space<smem>>
    %c1_i32_21 = arith.constant 1 : i32
    %159 = tpu.dynamic_rotate %150 by %c1_i32_21 dim 1 : vector<8x128xf32>, i32 -> vector<8x128xf32>
    %160 = vector.broadcast %158 : f32 to vector<8x128xf32>
    %161 = arith.mulf %160, %159 : vector<8x128xf32>
    %162 = arith.addf %157, %161 : vector<8x128xf32>
    %c12 = arith.constant 12 : index
    %163 = memref.load %arg2[%c12] : memref<86xf32, #tpu.memory_space<smem>>
    %164 = vector.broadcast %163 : f32 to vector<8x128xf32>
    %165 = arith.mulf %164, %150 : vector<8x128xf32>
    %166 = arith.addf %162, %165 : vector<8x128xf32>
    %c13 = arith.constant 13 : index
    %167 = memref.load %arg2[%c13] : memref<86xf32, #tpu.memory_space<smem>>
    %c127_i32_22 = arith.constant 127 : i32
    %168 = tpu.dynamic_rotate %150 by %c127_i32_22 dim 1 : vector<8x128xf32>, i32 -> vector<8x128xf32>
    %169 = vector.broadcast %167 : f32 to vector<8x128xf32>
    %170 = arith.mulf %169, %168 : vector<8x128xf32>
    %171 = arith.addf %166, %170 : vector<8x128xf32>
    %c14 = arith.constant 14 : index
    %172 = memref.load %arg2[%c14] : memref<86xf32, #tpu.memory_space<smem>>
    %c126_i32_23 = arith.constant 126 : i32
    %173 = tpu.dynamic_rotate %150 by %c126_i32_23 dim 1 : vector<8x128xf32>, i32 -> vector<8x128xf32>
    %174 = vector.broadcast %172 : f32 to vector<8x128xf32>
    %175 = arith.mulf %174, %173 : vector<8x128xf32>
    %176 = arith.addf %171, %175 : vector<8x128xf32>
    %cst_24 = arith.constant 0.000000e+00 : f32
    %177 = vector.broadcast %cst_24 : f32 to vector<8x128xf32>
    %178 = arith.select %2, %176, %177 : vector<8x128xi1>, vector<8x128xf32>
    %c41 = arith.constant 41 : index
    %179 = memref.load %arg2[%c41] : memref<86xf32, #tpu.memory_space<smem>>
    %c32 = arith.constant 32 : index
    %180 = memref.load %arg2[%c32] : memref<86xf32, #tpu.memory_space<smem>>
    %c9_i32_25 = arith.constant 9 : i32
    %181 = tpu.dynamic_rotate %178 by %c9_i32_25 dim 1 : vector<8x128xf32>, i32 -> vector<8x128xf32>
    %182 = vector.broadcast %180 : f32 to vector<8x128xf32>
    %183 = arith.mulf %182, %181 : vector<8x128xf32>
    %184 = vector.broadcast %179 : f32 to vector<8x128xf32>
    %185 = arith.addf %184, %183 : vector<8x128xf32>
    %c33 = arith.constant 33 : index
    %186 = memref.load %arg2[%c33] : memref<86xf32, #tpu.memory_space<smem>>
    %c6_i32_26 = arith.constant 6 : i32
    %187 = tpu.dynamic_rotate %178 by %c6_i32_26 dim 1 : vector<8x128xf32>, i32 -> vector<8x128xf32>
    %188 = vector.broadcast %186 : f32 to vector<8x128xf32>
    %189 = arith.mulf %188, %187 : vector<8x128xf32>
    %190 = arith.addf %185, %189 : vector<8x128xf32>
    %c34 = arith.constant 34 : index
    %191 = memref.load %arg2[%c34] : memref<86xf32, #tpu.memory_space<smem>>
    %c3_i32_27 = arith.constant 3 : i32
    %192 = tpu.dynamic_rotate %178 by %c3_i32_27 dim 1 : vector<8x128xf32>, i32 -> vector<8x128xf32>
    %193 = vector.broadcast %191 : f32 to vector<8x128xf32>
    %194 = arith.mulf %193, %192 : vector<8x128xf32>
    %195 = arith.addf %190, %194 : vector<8x128xf32>
    %c35 = arith.constant 35 : index
    %196 = memref.load %arg2[%c35] : memref<86xf32, #tpu.memory_space<smem>>
    %197 = vector.broadcast %196 : f32 to vector<8x128xf32>
    %198 = arith.mulf %197, %178 : vector<8x128xf32>
    %199 = arith.addf %195, %198 : vector<8x128xf32>
    %c36 = arith.constant 36 : index
    %200 = memref.load %arg2[%c36] : memref<86xf32, #tpu.memory_space<smem>>
    %c125_i32_28 = arith.constant 125 : i32
    %201 = tpu.dynamic_rotate %178 by %c125_i32_28 dim 1 : vector<8x128xf32>, i32 -> vector<8x128xf32>
    %202 = vector.broadcast %200 : f32 to vector<8x128xf32>
    %203 = arith.mulf %202, %201 : vector<8x128xf32>
    %204 = arith.addf %199, %203 : vector<8x128xf32>
    %c37 = arith.constant 37 : index
    %205 = memref.load %arg2[%c37] : memref<86xf32, #tpu.memory_space<smem>>
    %c122_i32_29 = arith.constant 122 : i32
    %206 = tpu.dynamic_rotate %178 by %c122_i32_29 dim 1 : vector<8x128xf32>, i32 -> vector<8x128xf32>
    %207 = vector.broadcast %205 : f32 to vector<8x128xf32>
    %208 = arith.mulf %207, %206 : vector<8x128xf32>
    %209 = arith.addf %204, %208 : vector<8x128xf32>
    %c38 = arith.constant 38 : index
    %210 = memref.load %arg2[%c38] : memref<86xf32, #tpu.memory_space<smem>>
    %c119_i32_30 = arith.constant 119 : i32
    %211 = tpu.dynamic_rotate %178 by %c119_i32_30 dim 1 : vector<8x128xf32>, i32 -> vector<8x128xf32>
    %212 = vector.broadcast %210 : f32 to vector<8x128xf32>
    %213 = arith.mulf %212, %211 : vector<8x128xf32>
    %214 = arith.addf %209, %213 : vector<8x128xf32>
    %c44 = arith.constant 44 : index
    %215 = memref.load %arg2[%c44] : memref<86xf32, #tpu.memory_space<smem>>
    %216 = vector.broadcast %215 : f32 to vector<8x128xf32>
    %217 = arith.mulf %216, %178 : vector<8x128xf32>
    %c47 = arith.constant 47 : index
    %218 = memref.load %arg2[%c47] : memref<86xf32, #tpu.memory_space<smem>>
    %219 = vector.broadcast %218 : f32 to vector<8x128xf32>
    %220 = arith.mulf %219, %214 : vector<8x128xf32>
    %221 = arith.addf %147, %217 : vector<8x128xf32>
    %222 = arith.addf %148, %220 : vector<8x128xf32>
    %c54 = arith.constant 54 : index
    %223 = memref.load %arg2[%c54] : memref<86xf32, #tpu.memory_space<smem>>
    %224 = vector.broadcast %223 : f32 to vector<8x128xf32>
    %225 = arith.addf %221, %224 : vector<8x128xf32>
    %cst_31 = arith.constant 0.000000e+00 : f32
    %226 = vector.broadcast %cst_31 : f32 to vector<8x128xf32>
    %227 = arith.select %2, %225, %226 : vector<8x128xi1>, vector<8x128xf32>
    %c55 = arith.constant 55 : index
    %228 = memref.load %arg2[%c55] : memref<86xf32, #tpu.memory_space<smem>>
    %229 = vector.broadcast %228 : f32 to vector<8x128xf32>
    %230 = arith.addf %222, %229 : vector<8x128xf32>
    %cst_32 = arith.constant 0.000000e+00 : f32
    %231 = vector.broadcast %cst_32 : f32 to vector<8x128xf32>
    %232 = arith.select %2, %230, %231 : vector<8x128xi1>, vector<8x128xf32>
    %233 = arith.addf %227, %232 : vector<8x128xf32>
    %cst_33 = arith.constant 5.000000e-01 : f32
    %234 = vector.broadcast %cst_33 : f32 to vector<8x128xf32>
    %235 = arith.mulf %234, %233 : vector<8x128xf32>
    %236 = arith.maximumf %227, %232 : vector<8x128xf32>
    %c3_i32_34 = arith.constant 3 : i32
    %237 = tpu.dynamic_rotate %235 by %c3_i32_34 dim 1 : vector<8x128xf32>, i32 -> vector<8x128xf32>
    %c3_i32_35 = arith.constant 3 : i32
    %238 = tpu.dynamic_rotate %236 by %c3_i32_35 dim 1 : vector<8x128xf32>, i32 -> vector<8x128xf32>
    %c56 = arith.constant 56 : index
    %239 = memref.load %arg2[%c56] : memref<86xf32, #tpu.memory_space<smem>>
    %240 = vector.broadcast %239 : f32 to vector<8x128xf32>
    %241 = arith.mulf %240, %237 : vector<8x128xf32>
    %c63 = arith.constant 63 : index
    %242 = memref.load %arg2[%c63] : memref<86xf32, #tpu.memory_space<smem>>
    %243 = vector.broadcast %242 : f32 to vector<8x128xf32>
    %244 = arith.mulf %243, %238 : vector<8x128xf32>
    %245 = arith.addf %241, %244 : vector<8x128xf32>
    %c70 = arith.constant 70 : index
    %246 = memref.load %arg2[%c70] : memref<86xf32, #tpu.memory_space<smem>>
    %247 = vector.broadcast %246 : f32 to vector<8x128xf32>
    %248 = arith.mulf %247, %237 : vector<8x128xf32>
    %c77 = arith.constant 77 : index
    %249 = memref.load %arg2[%c77] : memref<86xf32, #tpu.memory_space<smem>>
    %250 = vector.broadcast %249 : f32 to vector<8x128xf32>
    %251 = arith.mulf %250, %238 : vector<8x128xf32>
    %252 = arith.addf %248, %251 : vector<8x128xf32>
    %c2_i32_36 = arith.constant 2 : i32
    %253 = tpu.dynamic_rotate %235 by %c2_i32_36 dim 1 : vector<8x128xf32>, i32 -> vector<8x128xf32>
    %c2_i32_37 = arith.constant 2 : i32
    %254 = tpu.dynamic_rotate %236 by %c2_i32_37 dim 1 : vector<8x128xf32>, i32 -> vector<8x128xf32>
    %c57 = arith.constant 57 : index
    %255 = memref.load %arg2[%c57] : memref<86xf32, #tpu.memory_space<smem>>
    %256 = vector.broadcast %255 : f32 to vector<8x128xf32>
    %257 = arith.mulf %256, %253 : vector<8x128xf32>
    %c64 = arith.constant 64 : index
    %258 = memref.load %arg2[%c64] : memref<86xf32, #tpu.memory_space<smem>>
    %259 = vector.broadcast %258 : f32 to vector<8x128xf32>
    %260 = arith.mulf %259, %254 : vector<8x128xf32>
    %261 = arith.addf %257, %260 : vector<8x128xf32>
    %c71 = arith.constant 71 : index
    %262 = memref.load %arg2[%c71] : memref<86xf32, #tpu.memory_space<smem>>
    %263 = vector.broadcast %262 : f32 to vector<8x128xf32>
    %264 = arith.mulf %263, %253 : vector<8x128xf32>
    %c78 = arith.constant 78 : index
    %265 = memref.load %arg2[%c78] : memref<86xf32, #tpu.memory_space<smem>>
    %266 = vector.broadcast %265 : f32 to vector<8x128xf32>
    %267 = arith.mulf %266, %254 : vector<8x128xf32>
    %268 = arith.addf %264, %267 : vector<8x128xf32>
    %269 = arith.addf %245, %261 : vector<8x128xf32>
    %270 = arith.addf %252, %268 : vector<8x128xf32>
    %c1_i32_38 = arith.constant 1 : i32
    %271 = tpu.dynamic_rotate %235 by %c1_i32_38 dim 1 : vector<8x128xf32>, i32 -> vector<8x128xf32>
    %c1_i32_39 = arith.constant 1 : i32
    %272 = tpu.dynamic_rotate %236 by %c1_i32_39 dim 1 : vector<8x128xf32>, i32 -> vector<8x128xf32>
    %c58 = arith.constant 58 : index
    %273 = memref.load %arg2[%c58] : memref<86xf32, #tpu.memory_space<smem>>
    %274 = vector.broadcast %273 : f32 to vector<8x128xf32>
    %275 = arith.mulf %274, %271 : vector<8x128xf32>
    %c65 = arith.constant 65 : index
    %276 = memref.load %arg2[%c65] : memref<86xf32, #tpu.memory_space<smem>>
    %277 = vector.broadcast %276 : f32 to vector<8x128xf32>
    %278 = arith.mulf %277, %272 : vector<8x128xf32>
    %279 = arith.addf %275, %278 : vector<8x128xf32>
    %c72 = arith.constant 72 : index
    %280 = memref.load %arg2[%c72] : memref<86xf32, #tpu.memory_space<smem>>
    %281 = vector.broadcast %280 : f32 to vector<8x128xf32>
    %282 = arith.mulf %281, %271 : vector<8x128xf32>
    %c79 = arith.constant 79 : index
    %283 = memref.load %arg2[%c79] : memref<86xf32, #tpu.memory_space<smem>>
    %284 = vector.broadcast %283 : f32 to vector<8x128xf32>
    %285 = arith.mulf %284, %272 : vector<8x128xf32>
    %286 = arith.addf %282, %285 : vector<8x128xf32>
    %287 = arith.addf %269, %279 : vector<8x128xf32>
    %288 = arith.addf %270, %286 : vector<8x128xf32>
    %c59 = arith.constant 59 : index
    %289 = memref.load %arg2[%c59] : memref<86xf32, #tpu.memory_space<smem>>
    %290 = vector.broadcast %289 : f32 to vector<8x128xf32>
    %291 = arith.mulf %290, %235 : vector<8x128xf32>
    %c66 = arith.constant 66 : index
    %292 = memref.load %arg2[%c66] : memref<86xf32, #tpu.memory_space<smem>>
    %293 = vector.broadcast %292 : f32 to vector<8x128xf32>
    %294 = arith.mulf %293, %236 : vector<8x128xf32>
    %295 = arith.addf %291, %294 : vector<8x128xf32>
    %c73 = arith.constant 73 : index
    %296 = memref.load %arg2[%c73] : memref<86xf32, #tpu.memory_space<smem>>
    %297 = vector.broadcast %296 : f32 to vector<8x128xf32>
    %298 = arith.mulf %297, %235 : vector<8x128xf32>
    %c80 = arith.constant 80 : index
    %299 = memref.load %arg2[%c80] : memref<86xf32, #tpu.memory_space<smem>>
    %300 = vector.broadcast %299 : f32 to vector<8x128xf32>
    %301 = arith.mulf %300, %236 : vector<8x128xf32>
    %302 = arith.addf %298, %301 : vector<8x128xf32>
    %303 = arith.addf %287, %295 : vector<8x128xf32>
    %304 = arith.addf %288, %302 : vector<8x128xf32>
    %c127_i32_40 = arith.constant 127 : i32
    %305 = tpu.dynamic_rotate %235 by %c127_i32_40 dim 1 : vector<8x128xf32>, i32 -> vector<8x128xf32>
    %c127_i32_41 = arith.constant 127 : i32
    %306 = tpu.dynamic_rotate %236 by %c127_i32_41 dim 1 : vector<8x128xf32>, i32 -> vector<8x128xf32>
    %c60 = arith.constant 60 : index
    %307 = memref.load %arg2[%c60] : memref<86xf32, #tpu.memory_space<smem>>
    %308 = vector.broadcast %307 : f32 to vector<8x128xf32>
    %309 = arith.mulf %308, %305 : vector<8x128xf32>
    %c67 = arith.constant 67 : index
    %310 = memref.load %arg2[%c67] : memref<86xf32, #tpu.memory_space<smem>>
    %311 = vector.broadcast %310 : f32 to vector<8x128xf32>
    %312 = arith.mulf %311, %306 : vector<8x128xf32>
    %313 = arith.addf %309, %312 : vector<8x128xf32>
    %c74 = arith.constant 74 : index
    %314 = memref.load %arg2[%c74] : memref<86xf32, #tpu.memory_space<smem>>
    %315 = vector.broadcast %314 : f32 to vector<8x128xf32>
    %316 = arith.mulf %315, %305 : vector<8x128xf32>
    %c81 = arith.constant 81 : index
    %317 = memref.load %arg2[%c81] : memref<86xf32, #tpu.memory_space<smem>>
    %318 = vector.broadcast %317 : f32 to vector<8x128xf32>
    %319 = arith.mulf %318, %306 : vector<8x128xf32>
    %320 = arith.addf %316, %319 : vector<8x128xf32>
    %321 = arith.addf %303, %313 : vector<8x128xf32>
    %322 = arith.addf %304, %320 : vector<8x128xf32>
    %c126_i32_42 = arith.constant 126 : i32
    %323 = tpu.dynamic_rotate %235 by %c126_i32_42 dim 1 : vector<8x128xf32>, i32 -> vector<8x128xf32>
    %c126_i32_43 = arith.constant 126 : i32
    %324 = tpu.dynamic_rotate %236 by %c126_i32_43 dim 1 : vector<8x128xf32>, i32 -> vector<8x128xf32>
    %c61 = arith.constant 61 : index
    %325 = memref.load %arg2[%c61] : memref<86xf32, #tpu.memory_space<smem>>
    %326 = vector.broadcast %325 : f32 to vector<8x128xf32>
    %327 = arith.mulf %326, %323 : vector<8x128xf32>
    %c68 = arith.constant 68 : index
    %328 = memref.load %arg2[%c68] : memref<86xf32, #tpu.memory_space<smem>>
    %329 = vector.broadcast %328 : f32 to vector<8x128xf32>
    %330 = arith.mulf %329, %324 : vector<8x128xf32>
    %331 = arith.addf %327, %330 : vector<8x128xf32>
    %c75 = arith.constant 75 : index
    %332 = memref.load %arg2[%c75] : memref<86xf32, #tpu.memory_space<smem>>
    %333 = vector.broadcast %332 : f32 to vector<8x128xf32>
    %334 = arith.mulf %333, %323 : vector<8x128xf32>
    %c82 = arith.constant 82 : index
    %335 = memref.load %arg2[%c82] : memref<86xf32, #tpu.memory_space<smem>>
    %336 = vector.broadcast %335 : f32 to vector<8x128xf32>
    %337 = arith.mulf %336, %324 : vector<8x128xf32>
    %338 = arith.addf %334, %337 : vector<8x128xf32>
    %339 = arith.addf %321, %331 : vector<8x128xf32>
    %340 = arith.addf %322, %338 : vector<8x128xf32>
    %c125_i32_44 = arith.constant 125 : i32
    %341 = tpu.dynamic_rotate %235 by %c125_i32_44 dim 1 : vector<8x128xf32>, i32 -> vector<8x128xf32>
    %c125_i32_45 = arith.constant 125 : i32
    %342 = tpu.dynamic_rotate %236 by %c125_i32_45 dim 1 : vector<8x128xf32>, i32 -> vector<8x128xf32>
    %c62 = arith.constant 62 : index
    %343 = memref.load %arg2[%c62] : memref<86xf32, #tpu.memory_space<smem>>
    %344 = vector.broadcast %343 : f32 to vector<8x128xf32>
    %345 = arith.mulf %344, %341 : vector<8x128xf32>
    %c69 = arith.constant 69 : index
    %346 = memref.load %arg2[%c69] : memref<86xf32, #tpu.memory_space<smem>>
    %347 = vector.broadcast %346 : f32 to vector<8x128xf32>
    %348 = arith.mulf %347, %342 : vector<8x128xf32>
    %349 = arith.addf %345, %348 : vector<8x128xf32>
    %c76 = arith.constant 76 : index
    %350 = memref.load %arg2[%c76] : memref<86xf32, #tpu.memory_space<smem>>
    %351 = vector.broadcast %350 : f32 to vector<8x128xf32>
    %352 = arith.mulf %351, %341 : vector<8x128xf32>
    %c83 = arith.constant 83 : index
    %353 = memref.load %arg2[%c83] : memref<86xf32, #tpu.memory_space<smem>>
    %354 = vector.broadcast %353 : f32 to vector<8x128xf32>
    %355 = arith.mulf %354, %342 : vector<8x128xf32>
    %356 = arith.addf %352, %355 : vector<8x128xf32>
    %357 = arith.addf %339, %349 : vector<8x128xf32>
    %358 = arith.addf %340, %356 : vector<8x128xf32>
    %c84 = arith.constant 84 : index
    %359 = memref.load %arg2[%c84] : memref<86xf32, #tpu.memory_space<smem>>
    %360 = vector.broadcast %359 : f32 to vector<8x128xf32>
    %361 = arith.addf %357, %360 : vector<8x128xf32>
    %362 = arith.negf %361 : vector<8x128xf32>
    %363 = math.exp %362 : vector<8x128xf32>
    %cst_46 = arith.constant 1.000000e+00 : f32
    %364 = vector.broadcast %cst_46 : f32 to vector<8x128xf32>
    %365 = arith.addf %364, %363 : vector<8x128xf32>
    %366 = arith.divf %364, %365 : vector<8x128xf32>
    %c85 = arith.constant 85 : index
    %367 = memref.load %arg2[%c85] : memref<86xf32, #tpu.memory_space<smem>>
    %368 = vector.broadcast %367 : f32 to vector<8x128xf32>
    %369 = arith.addf %358, %368 : vector<8x128xf32>
    %370 = arith.negf %369 : vector<8x128xf32>
    %371 = math.exp %370 : vector<8x128xf32>
    %cst_47 = arith.constant 1.000000e+00 : f32
    %372 = vector.broadcast %cst_47 : f32 to vector<8x128xf32>
    %373 = arith.addf %372, %371 : vector<8x128xf32>
    %374 = arith.divf %372, %373 : vector<8x128xf32>
    %375 = arith.mulf %227, %366 : vector<8x128xf32>
    %376 = arith.mulf %232, %374 : vector<8x128xf32>
    %377 = arith.addf %375, %376 : vector<8x128xf32>
    %c48 = arith.constant 48 : index
    %378 = memref.load %arg2[%c48] : memref<86xf32, #tpu.memory_space<smem>>
    %379 = vector.broadcast %378 : f32 to vector<8x128xf32>
    %380 = arith.mulf %379, %377 : vector<8x128xf32>
    %c51 = arith.constant 51 : index
    %381 = memref.load %arg2[%c51] : memref<86xf32, #tpu.memory_space<smem>>
    %382 = vector.broadcast %381 : f32 to vector<8x128xf32>
    %383 = arith.addf %380, %382 : vector<8x128xf32>
    %cst_48 = arith.constant 1.000000e+00 : f32
    %384 = vector.broadcast %cst_48 : f32 to vector<8x128xf32>
    %385 = arith.addf %384, %383 : vector<8x128xf32>
    %386 = arith.mulf %4, %385 : vector<8x128xf32>
    %c0_49 = arith.constant 0 : index
    %c0_50 = arith.constant 0 : index
    %c0_51 = arith.constant 0 : index
    %387 = vector.load %arg3[%c0_49, %c0_50, %c0_51] : memref<1x24x128xf32, #tpu.memory_space<vmem>>, vector<1x8x128xf32>
    %388 = vector.shape_cast %387 : vector<1x8x128xf32> to vector<8x128xf32>
    %389 = vector.shape_cast %386 : vector<8x128xf32> to vector<1x8x128xf32>
    tpu.vector_store %arg3[%c0_49, %c0_50, %c0_51], %389 {strides = array<i32>} : memref<1x24x128xf32, #tpu.memory_space<vmem>>, vector<1x8x128xf32>,
    %c49 = arith.constant 49 : index
    %390 = memref.load %arg2[%c49] : memref<86xf32, #tpu.memory_space<smem>>
    %391 = vector.broadcast %390 : f32 to vector<8x128xf32>
    %392 = arith.mulf %391, %377 : vector<8x128xf32>
    %c52 = arith.constant 52 : index
    %393 = memref.load %arg2[%c52] : memref<86xf32, #tpu.memory_space<smem>>
    %394 = vector.broadcast %393 : f32 to vector<8x128xf32>
    %395 = arith.addf %392, %394 : vector<8x128xf32>
    %cst_52 = arith.constant 1.000000e+00 : f32
    %396 = vector.broadcast %cst_52 : f32 to vector<8x128xf32>
    %397 = arith.addf %396, %395 : vector<8x128xf32>
    %398 = arith.mulf %76, %397 : vector<8x128xf32>
    %c0_53 = arith.constant 0 : index
    %c8_54 = arith.constant 8 : index
    %c0_55 = arith.constant 0 : index
    %399 = vector.load %arg3[%c0_53, %c8_54, %c0_55] : memref<1x24x128xf32, #tpu.memory_space<vmem>>, vector<1x8x128xf32>
    %400 = vector.shape_cast %399 : vector<1x8x128xf32> to vector<8x128xf32>
    %401 = vector.shape_cast %398 : vector<8x128xf32> to vector<1x8x128xf32>
    tpu.vector_store %arg3[%c0_53, %c8_54, %c0_55], %401 {strides = array<i32>} : memref<1x24x128xf32, #tpu.memory_space<vmem>>, vector<1x8x128xf32>,
    %c50 = arith.constant 50 : index
    %402 = memref.load %arg2[%c50] : memref<86xf32, #tpu.memory_space<smem>>
    %403 = vector.broadcast %402 : f32 to vector<8x128xf32>
    %404 = arith.mulf %403, %377 : vector<8x128xf32>
    %c53 = arith.constant 53 : index
    %405 = memref.load %arg2[%c53] : memref<86xf32, #tpu.memory_space<smem>>
    %406 = vector.broadcast %405 : f32 to vector<8x128xf32>
    %407 = arith.addf %404, %406 : vector<8x128xf32>
    %cst_56 = arith.constant 1.000000e+00 : f32
    %408 = vector.broadcast %cst_56 : f32 to vector<8x128xf32>
    %409 = arith.addf %408, %407 : vector<8x128xf32>
    %410 = arith.mulf %150, %409 : vector<8x128xf32>
    %c0_57 = arith.constant 0 : index
    %c16_58 = arith.constant 16 : index
    %c0_59 = arith.constant 0 : index
    %411 = vector.load %arg3[%c0_57, %c16_58, %c0_59] : memref<1x24x128xf32, #tpu.memory_space<vmem>>, vector<1x8x128xf32>
    %412 = vector.shape_cast %411 : vector<1x8x128xf32> to vector<8x128xf32>
    %413 = vector.shape_cast %410 : vector<8x128xf32> to vector<1x8x128xf32>
    tpu.vector_store %arg3[%c0_57, %c16_58, %c0_59], %413 {strides = array<i32>} : memref<1x24x128xf32, #tpu.memory_space<vmem>>, vector<1x8x128xf32>,
    return
  }
  func.func @transform_0(%arg0: i32) -> (i32, i32, i32) {
    %c0_i32 = arith.constant 0 : i32
    %c0_i32_0 = arith.constant 0 : i32
    %c0_i32_1 = arith.constant 0 : i32
    return %arg0, %c0_i32, %c0_i32_0 : i32, i32, i32
  }
  func.func @transform_1(%arg0: i32) -> i32 {
    %c0_i32 = arith.constant 0 : i32
    %c0_i32_0 = arith.constant 0 : i32
    return %c0_i32 : i32
  }
  func.func @transform_2(%arg0: i32) -> (i32, i32, i32) {
    %c0_i32 = arith.constant 0 : i32
    %c0_i32_0 = arith.constant 0 : i32
    %c0_i32_1 = arith.constant 0 : i32
    return %arg0, %c0_i32, %c0_i32_0 : i32, i32, i32
  }
}

</mosaic_0001>

<bundles_post_ra>
// kernel: mtad_gat_forward.1
= control target key start
LH: loop header
LB: loop body
LE: loop exit
PB: predicated region body
PF: predicated region fallthrough
CT: control target
= control target key end

     0   :  { %7 = vsyncpa [#allocation3], 0  ;;  %s914_s0 = inlined_call_operand.vmem [shape: f32[1,24,128], index: 0, kind: input, shape index: {}]   ;;  %s915_s1 = inlined_call_operand.vmem [shape: f32[86], index: 1, kind: input, shape index: {}]   ;;  %s916_s2 = inlined_call_operand.vmem [shape: f32[1,24,128], index: 2, kind: output, shape index: {}]  }
   0x1   :  { %s16_s11 = sshll.u32 %s915_s1, 4  ;;  %s17_s11 = int_to_ptr.vmem [resolvable:$true] %s16_s11 }
   0x2   :  { %s575_s12 = scalar_lea.vmem %s17_s11, 16  ;;  %p580_p1 = scmp.lt.s32.totalorder %s17_s11, %s17_s11 }
   0x3   :  { %p576_p0 = scmp.ne.s32.totalorder %s17_s11, %s575_s12  ;;  %p581_p2 = scmp.lt.s32.totalorder %s575_s12, %s575_s12 }
   0x5   :  { %p582_p3 = por %p581_p2, %p580_p1 }
   0x7   :  { %p583_p4 = pnand %p582_p3, %p576_p0 }
   0x9   :  { %586 = shalt.err (!%p583_p4)
}
   0xa   :  { %s589_s13 = smov [#allocation2]  }
   0xb   :  { %19 = dma.vmem_to_smem %s17_s11, 16, %s589_s13, [#allocation3]  }
   0xc   :  { %587 = dma.done.wait [#allocation3], 16  }
   0xd   :  { %588 = vsyncadd [#allocation3], 4294967280 }
   0xe   :  { %23 = sfence }
   0xf   :  { %v621_v0 = vld [vmem:[%s914_s0] sm:$0xff]  ;;  %s590_s16 = smov 1   ;;  %s591_s1 = smov 2   ;;  %v630_v1 = vld [vmem:[%s914_s0 + $0x8] sm:$0xff]  ;;  %v639_v2 = vld [vmem:[%s914_s0 + $0x10] sm:$0xff]  ;;  %v24_v29 = vlaneseq }
  0x10   :  { %37 = vrot.lane.b32.xlu1 %v621_v0, %s590_s16  ;;  %30 = vrot.lane.b32.xlu0 %v621_v0, %s591_s1  ;;  %s592_s21 = smov 127   ;;  %s593_s22 = smov 126  }
  0x11   :  { %s470_s0 = sld [smem:[#allocation2 + $0x1]]  ;;  %v696_v42 = vand.u32 127, %v24_v29  ;;  %s594_s15 = smov 9  }
  0x12   :  { %s469_s23 = sld [smem:[#allocation2 + $0xf]]  ;;  %s595_s17 = smov 6  }
  0x13   :  { %s29_s24 = sld [smem:[#allocation2]]  ;;  %vm26_vm0 = vcmp.lt.s32.totalorder %v696_v42, 48  ;;  %s596_s18 = smov 3  }
  0x14   :  { %117 = vrot.lane.b32.xlu1 %v630_v1, %s590_s16  ;;  %110 = vrot.lane.b32.xlu0 %v630_v1, %s591_s1  ;;  %s486_s25 = sld [smem:[#allocation2 + $0x6]]  ;;  %s597_s19 = smov 125  }
  0x15   :  { %s485_s26 = sld [smem:[#allocation2 + $0x5]]  ;;  %s598_s20 = smov 122  }
  0x16   :  { %s484_s27 = sld [smem:[#allocation2 + $0x10]] }
  0x17   :  { %s657_s28 = sld [smem:[#allocation2 + $0xb]]  ;;  %v39_v8 = vstv %s470_s0  ;;  %s599_s0 = smov 119  }
  0x18   :  { %199 = vrot.lane.b32.xlu1 %v639_v2, %s590_s16  ;;  %192 = vrot.lane.b32.xlu0 %v639_v2, %s591_s1  ;;  %s659_s29 = sld [smem:[#allocation2 + $0x11]]  ;;  %v34_v9 = vstv %s469_s23 }
  0x19   :  { %s661_s30 = sld [smem:[#allocation2 + $0xa]]  ;;  %v32_v4 = vstv %s29_s24 }
  0x1a   :  { %s663_s3 = sld [smem:[#allocation2 + $0x7]]  ;;  %v119_v10 = vstv %s486_s25 }
  0x1b   :  { %s665_s4 = sld [smem:[#allocation2 + $0x2]]  ;;  %v112_v6 = vstv %s485_s26 }
  0x1c   :  { %127 = vrot.lane.b32.xlu1 %v630_v1, %s592_s21  ;;  %47 = vrot.lane.b32.xlu0 %v621_v0, %s592_s21  ;;  %s667_s5 = sld [smem:[#allocation2 + $0x8]]  ;;  %v114_v12 = vstv %s484_s27 }
  0x1d   :  { %s669_s6 = sld [smem:[#allocation2 + $0x3]]  ;;  %v201_v24 = vstv %s657_s28 }
  0x1e   :  { %s671_s7 = sld [smem:[#allocation2 + $0x9]]  ;;  %v196_v25 = vstv %s659_s29 }
  0x1f   :  { %s673_s8 = sld [smem:[#allocation2 + $0xc]]  ;;  %v194_v15 = vstv %s661_s30 }
  0x20   :  { %133 = vrot.lane.b32.xlu1 %v630_v1, %s593_s22  ;;  %53 = vrot.lane.b32.xlu0 %v621_v0, %s593_s22  ;;  %s676_s9 = sld [smem:[#allocation2 + $0x4]]  ;;  %v123_v22 = vstv %s663_s3 }
  0x21   :  { %v43_v23 = vstv %s665_s4  ;;  %s680_s10 = sld [smem:[#allocation2 + $0x2b]]  ;;  %v124_v32 = vmul.f32 %v123_v22, %v630_v1 }
  0x22   :  { %s684_s11 = sld [smem:[#allocation2 + $0xd]]  ;;  %v129_v27 = vstv %s667_s5  ;;  %v44_v33 = vmul.f32 %v43_v23, %v621_v0 }
  0x23   :  { %v49_v28 = vstv %s669_s6  ;;  %s688_s12 = sld [smem:[#allocation2 + $0xe]] }
  0x24   :  { %209 = vrot.lane.b32.xlu0 %v639_v2, %s592_s21  ;;  %215 = vrot.lane.b32.xlu1 %v639_v2, %s593_s22  ;;  %s692_s13 = sld [smem:[#allocation2 + $0x2a]]  ;;  %v135_v41 = vstv %s671_s7 }
  0x25   :  { %v205_v40 = vstv %s673_s8  ;;  %s514_s14 = sld [smem:[#allocation2 + $0x2c]] }
  0x26   :  { %v55_v43 = vstv %s676_s9  ;;  %v206_v49 = vmul.f32 %v205_v40, %v639_v2  ;;  %s746_s23 = sld [smem:[#allocation2 + $0x15]] }
  0x27   :  { %v182_v56 = vstv %s680_s10  ;;  %s748_s24 = sld [smem:[#allocation2 + $0x1c]] }
  0x28   :  { %v211_v54 = vstv %s684_s11  ;;  %s750_s25 = sld [smem:[#allocation2 + $0x28]] }
  0x29   :  { %v217_v55 = vstv %s688_s12  ;;  %s491_s26 = sld [smem:[#allocation2 + $0x19]] }
  0x2a   :  { %v102_v58 = vstv %s692_s13  ;;  %s475_s27 = sld [smem:[#allocation2 + $0x12]] }
  0x2b   :  { %s752_s28 = sld [smem:[#allocation2 + $0x27]] }
  0x2c   :  { %s476_s29 = sld [smem:[#allocation2 + $0x13]] }
  0x2d   :  { %s492_s30 = sld [smem:[#allocation2 + $0x1a]] }
  0x2e   :  { %s477_s3 = sld [smem:[#allocation2 + $0x14]] }
  0x2f   :  { %s754_s4 = sld [smem:[#allocation2 + $0x1b]]  ;;  %v143_v22 = vstv %s491_s26 }
  0x30   :  { %s756_s5 = sld [smem:[#allocation2 + $0x20]] }
  0x31   :  { %s758_s6 = sld [smem:[#allocation2 + $0x29]]  ;;  %v65_v29 = vstv %s752_s28 }
  0x32   :  { %s760_s7 = sld [smem:[#allocation2 + $0x21]]  ;;  %v70_v23 = vstv %s476_s29 }
  0x33   :  { %s762_s8 = sld [smem:[#allocation2 + $0x16]] }
  0x34   :  { %s764_s9 = sld [smem:[#allocation2 + $0x22]] }
  0x35   :  { %s766_s10 = sld [smem:[#allocation2 + $0x1d]] }
  0x36   :  { %s769_s11 = sld [smem:[#allocation2 + $0x17]] }
  0x37   :  { %s773_s12 = sld [smem:[#allocation2 + $0x1e]] }
  0x38   :  { %s775_s13 = sld [smem:[#allocation2 + $0x23]] }
  0x39   :  { %s516_s26 = sld [smem:[#allocation2 + $0x36]] }
  0x3a   :  { %s531_s28 = sld [smem:[#allocation2 + $0x42]] }
  0x3b   :  { %s533_s29 = sld [smem:[#allocation2 + $0x50]] }
  0x82   :  { %v38_v3 = vpop.permute.xlu1 %37  ;;  %v31_v5 = vpop.permute.xlu0 %30 }
  0x83   :  { %v33_v7 = vmul.f32 %v32_v4, %v31_v5  ;;  %v40_v16 = vmul.f32 %v39_v8, %v38_v3 }
  0x85   :  { %v35_v17 = vadd.f32 %v34_v9, %v33_v7 }
  0x86   :  { %v118_v11 = vpop.permute.xlu1 %117  ;;  %v111_v13 = vpop.permute.xlu0 %110 }
  0x87   :  { %v113_v14 = vmul.f32 %v112_v6, %v111_v13  ;;  %v120_v18 = vmul.f32 %v119_v10, %v118_v11  ;;  %v41_v30 = vadd.f32 %v40_v16, %v35_v17  ;;  %v264_v10 = vstv %s514_s14  ;;  %s778_s14 = sld [smem:[#allocation2 + $0x24]] }
  0x89   :  { %v115_v19 = vadd.f32 %v114_v12, %v113_v14  ;;  %v45_v45 = vadd.f32 %v44_v33, %v41_v30  ;;  %v76_v30 = vstv %s477_s3  ;;  %v156_v33 = vstv %s754_s4  ;;  %s532_s3 = sld [smem:[#allocation2 + $0x49]] }
  0x8a   :  { %v200_v20 = vpop.permute.xlu1 %199  ;;  %v193_v21 = vpop.permute.xlu0 %192  ;;  %s843_s4 = sld [smem:[#allocation2 + $0x4d]] }
  0x8b   :  { %v195_v26 = vmul.f32 %v194_v15, %v193_v21  ;;  %v121_v31 = vadd.f32 %v120_v18, %v115_v19  ;;  %v202_v34 = vmul.f32 %v201_v24, %v200_v20  ;;  %v63_v21 = vstv %s475_s27  ;;  %s517_s27 = sld [smem:[#allocation2 + $0x37]] }
  0x8d   :  { %v197_v35 = vadd.f32 %v196_v25, %v195_v26  ;;  %v125_v44 = vadd.f32 %v124_v32, %v121_v31  ;;  %v150_v25 = vstv %s492_s30  ;;  %v145_v31 = vstv %s750_s25  ;;  %s515_s25 = sld [smem:[#allocation2 + $0x2f]] }
  0x8e   :  { %v128_v36 = vpop.permute.xlu1 %127  ;;  %v48_v37 = vpop.permute.xlu0 %47  ;;  %s530_s30 = sld [smem:[#allocation2 + $0x3b]] }
  0x8f   :  { %v130_v38 = vmul.f32 %v129_v27, %v128_v36  ;;  %v50_v39 = vmul.f32 %v49_v28, %v48_v37  ;;  %v203_v46 = vadd.f32 %v202_v34, %v197_v35  ;;  %v225_v37 = vstv %s756_s5  ;;  %s520_s5 = sld [smem:[#allocation2 + $0x46]] }
  0x91   :  { %v131_v50 = vadd.f32 %v130_v38, %v125_v44  ;;  %v51_v51 = vadd.f32 %v50_v39, %v45_v45  ;;  %v207_v60 = vadd.f32 %v206_v49, %v203_v46  ;;  %v232_v44 = vstv %s760_s7  ;;  %s522_s7 = sld [smem:[#allocation2 + $0x39]] }
  0x92   :  { %v134_v47 = vpop.permute.xlu1 %133  ;;  %v54_v48 = vpop.permute.xlu0 %53  ;;  %v80_v45 = vstv %s746_s23  ;;  %v160_v49 = vstv %s748_s24  ;;  %s798_s23 = sld [smem:[#allocation2 + $0x25]] }
  0x93   :  { %v136_v52 = vmul.f32 %v135_v41, %v134_v47  ;;  %v56_v53 = vmul.f32 %v55_v43, %v54_v48  ;;  %v86_v48 = vstv %s762_s8  ;;  %s801_s24 = sld [smem:[#allocation2 + $0x26]] }
  0x94   :  { %s524_s8 = sld [smem:[#allocation2 + $0x47]] }
  0x95   :  { %v137_v57 = vadd.f32 %v136_v52, %v131_v50  ;;  %v57_v59 = vadd.f32 %v56_v53, %v51_v51  ;;  %v227_v51 = vstv %s758_s6  ;;  %v238_v52 = vstv %s764_s9  ;;  %s523_s6 = sld [smem:[#allocation2 + $0x40]] }
  0x96   :  { %v210_v61 = vpop.permute.xlu0 %209  ;;  %v216_v62 = vpop.permute.xlu1 %215  ;;  %s845_s9 = sld [smem:[#allocation2 + $0x41]] }
  0x97   :  { %v707_v63 = vsel %vm26_vm0, %v137_v57, 0.0  ;;  %v711_v3 = vsel %vm26_vm0, %v57_v59, 0.0  ;;  %v212_v4 = vmul.f32 %v211_v54, %v210_v61  ;;  %v218_v5 = vmul.f32 %v217_v55, %v216_v62 }
  0x98   :  { %v183_v6 = vmul.f32 %v182_v56, %v707_v63  ;;  %v103_v7 = vmul.f32 %v102_v58, %v711_v3  ;;  %141 = vrot.lane.b32.xlu1 %v707_v63, %s594_s15  ;;  %61 = vrot.lane.b32.xlu0 %v711_v3, %s594_s15  ;;  %v166_v54 = vstv %s766_s10  ;;  %v92_v58 = vstv %s769_s11  ;;  %s853_s10 = sld [smem:[#allocation2 + $0x43]] }
  0x99   :  { %v213_v8 = vadd.f32 %v212_v4, %v207_v60  ;;  %v81_v59 = vmul.f32 %v80_v45, %v711_v3  ;;  %v172_v61 = vstv %s773_s12  ;;  %v267_v45 = vstv %s515_s25  ;;  %s855_s11 = sld [smem:[#allocation2 + $0x51]] }
  0x9a   :  { %v187_v9 = vadd.f32 %v183_v6, %v103_v7  ;;  %s857_s12 = sld [smem:[#allocation2 + $0x3c]] }
  0x9b   :  { %v219_v11 = vadd.f32 %v218_v5, %v213_v8  ;;  %v161_v5 = vmul.f32 %v160_v49, %v707_v63  ;;  %v276_v49 = vstv %s517_s27  ;;  %s885_s25 = sld [smem:[#allocation2 + $0x4c]] }
  0x9c   :  { %148 = vrot.lane.b32.xlu1 %v707_v63, %s595_s17  ;;  %68 = vrot.lane.b32.xlu0 %v711_v3, %s595_s17  ;;  %s548_s27 = sld [smem:[#allocation2 + $0x55]] }
  0x9d   :  { %v721_v12 = vsel %vm26_vm0, %v219_v11, 0.0 }
  0x9e   :  { %v265_v13 = vmul.f32 %v264_v10, %v721_v12 }
  0xa0   :  { %74 = vrot.lane.b32.xlu1 %v711_v3, %s596_s18  ;;  %223 = vrot.lane.b32.xlu0 %v721_v12, %s594_s15  ;;  %v727_v14 = vadd.f32 %v265_v13, %v187_v9  ;;  %s780_s15 = sld [smem:[#allocation2 + $0x1f]]  ;;  %v242_v13 = vstv %s775_s13 }
  0xa1   :  { %s859_s13 = sld [smem:[#allocation2 + $0x4a]] }
  0xa4   :  { %230 = vrot.lane.b32.xlu1 %v721_v12, %s595_s17  ;;  %154 = vrot.lane.b32.xlu0 %v707_v63, %s596_s18  ;;  %s784_s17 = sld [smem:[#allocation2 + $0x18]] }
  0xa8   :  { %84 = vrot.lane.b32.xlu1 %v711_v3, %s597_s19  ;;  %236 = vrot.lane.b32.xlu0 %v721_v12, %s596_s18 }
  0xac   :  { %90 = vrot.lane.b32.xlu1 %v711_v3, %s598_s20  ;;  %164 = vrot.lane.b32.xlu0 %v707_v63, %s597_s19 }
  0xb0   :  { %246 = vrot.lane.b32.xlu1 %v721_v12, %s597_s19  ;;  %170 = vrot.lane.b32.xlu0 %v707_v63, %s598_s20 }
  0xb4   :  { %176 = vrot.lane.b32.xlu1 %v707_v63, %s599_s0  ;;  %96 = vrot.lane.b32.xlu0 %v711_v3, %s599_s0 }
  0xb8   :  { %258 = vrot.lane.b32.xlu1 %v721_v12, %s599_s0  ;;  %252 = vrot.lane.b32.xlu0 %v721_v12, %s598_s20  ;;  %s791_s20 = sld [smem:[#allocation2 + $0x2e]] }
  0xb9   :  { %s794_s0 = sld [smem:[#allocation2 + $0x2d]] }
 0x10a   :  { %v142_v15 = vpop.permute.xlu1 %141  ;;  %v62_v16 = vpop.permute.xlu0 %61 }
 0x10b   :  { %v64_v24 = vmul.f32 %v63_v21, %v62_v16  ;;  %v144_v28 = vmul.f32 %v143_v22, %v142_v15  ;;  %v243_v22 = vmul.f32 %v242_v13, %v721_v12 }
 0x10d   :  { %v66_v35 = vadd.f32 %v65_v29, %v64_v24  ;;  %v146_v40 = vadd.f32 %v145_v31, %v144_v28  ;;  %v185_v29 = vstv %s791_s20  ;;  %v254_v31 = vstv %s798_s23  ;;  %s873_s20 = sld [smem:[#allocation2 + $0x4b]] }
 0x10e   :  { %v149_v17 = vpop.permute.xlu1 %148  ;;  %v69_v18 = vpop.permute.xlu0 %68  ;;  %s877_s23 = sld [smem:[#allocation2 + $0x53]] }
 0x10f   :  { %v71_v32 = vmul.f32 %v70_v23, %v69_v18  ;;  %v151_v34 = vmul.f32 %v150_v25, %v149_v17  ;;  %v248_v17 = vstv %s778_s14  ;;  %v178_v18 = vstv %s780_s15  ;;  %s863_s14 = sld [smem:[#allocation2 + $0x44]] }
 0x110   :  { %s867_s15 = sld [smem:[#allocation2 + $0x52]] }
 0x111   :  { %v72_v43 = vadd.f32 %v71_v32, %v66_v35  ;;  %v152_v46 = vadd.f32 %v151_v34, %v146_v40  ;;  %v260_v35 = vstv %s801_s24  ;;  %s879_s24 = sld [smem:[#allocation2 + $0x3e]] }
 0x112   :  { %v75_v19 = vpop.permute.xlu1 %74  ;;  %v224_v20 = vpop.permute.xlu0 %223 }
 0x113   :  { %v77_v36 = vmul.f32 %v76_v30, %v75_v19  ;;  %v226_v47 = vmul.f32 %v225_v37, %v224_v20  ;;  %v98_v19 = vstv %s784_s17  ;;  %v105_v30 = vstv %s794_s0  ;;  %s869_s17 = sld [smem:[#allocation2 + $0x3d]] }
 0x114   :  { %s875_s0 = sld [smem:[#allocation2 + $0x45]] }
 0x115   :  { %v78_v50 = vadd.f32 %v77_v36, %v72_v43  ;;  %v228_v62 = vadd.f32 %v227_v51, %v226_v47  ;;  %v272_v47 = vstv %s516_s26  ;;  %s891_s26 = sld [smem:[#allocation2 + $0x54]] }
 0x116   :  { %v231_v26 = vpop.permute.xlu1 %230  ;;  %v155_v27 = vpop.permute.xlu0 %154  ;;  %v273_v51 = vadd.f32 %v272_v47, %v727_v14 }
 0x117   :  { %v157_v41 = vmul.f32 %v156_v33, %v155_v27  ;;  %v233_v56 = vmul.f32 %v232_v44, %v231_v26  ;;  %v82_v7 = vadd.f32 %v81_v59, %v78_v50  ;;  %v348_v59 = vstv %s532_s3  ;;  %s554_s3 = sld [smem:[#allocation2 + $0x32]] }
 0x119   :  { %v158_v57 = vadd.f32 %v157_v41, %v152_v46  ;;  %v234_v11 = vadd.f32 %v233_v56, %v228_v62 }
 0x11a   :  { %v85_v38 = vpop.permute.xlu1 %84  ;;  %v237_v39 = vpop.permute.xlu0 %236 }
 0x11b   :  { %v87_v60 = vmul.f32 %v86_v48, %v85_v38  ;;  %v239_v4 = vmul.f32 %v238_v52, %v237_v39  ;;  %v162_v3 = vadd.f32 %v161_v5, %v158_v57  ;;  %v341_v57 = vstv %s530_s30  ;;  %s552_s30 = sld [smem:[#allocation2 + $0x31]] }
 0x11d   :  { %v88_v16 = vadd.f32 %v87_v60, %v82_v7  ;;  %v240_v20 = vadd.f32 %v239_v4, %v234_v11  ;;  %v351_v60 = vstv %s533_s29  ;;  %v308_v11 = vstv %s523_s6  ;;  %s551_s29 = sld [smem:[#allocation2 + $0x33]] }
 0x11e   :  { %v91_v53 = vpop.permute.xlu1 %90  ;;  %v165_v55 = vpop.permute.xlu0 %164 }
 0x11f   :  { %v167_v6 = vmul.f32 %v166_v54, %v165_v55  ;;  %v93_v8 = vmul.f32 %v92_v58, %v91_v53  ;;  %v244_v32 = vadd.f32 %v243_v22, %v240_v20  ;;  %v815_v53 = vsel %vm26_vm0, %v273_v51, 0.0 }
 0x120   :  { %v344_v58 = vstv %s531_s28  ;;  %v384_v51 = vstv %s863_s14  ;;  %s550_s28 = sld [smem:[#allocation2 + $0x30]] }
 0x121   :  { %v168_v63 = vadd.f32 %v167_v6, %v162_v3  ;;  %v94_v21 = vadd.f32 %v93_v8, %v88_v16  ;;  %v312_v16 = vstv %s524_s8 }
 0x122   :  { %v247_v9 = vpop.permute.xlu1 %246  ;;  %v171_v10 = vpop.permute.xlu0 %170 }
 0x123   :  { %v173_v15 = vmul.f32 %v172_v61, %v171_v10  ;;  %v249_v25 = vmul.f32 %v248_v17, %v247_v9  ;;  %v294_v10 = vstv %s520_s5 }
 0x125   :  { %v174_v26 = vadd.f32 %v173_v15, %v168_v63  ;;  %v250_v38 = vadd.f32 %v249_v25, %v244_v32  ;;  %v305_v15 = vstv %s522_s7 }
 0x126   :  { %v177_v23 = vpop.permute.xlu1 %176  ;;  %v97_v24 = vpop.permute.xlu0 %96 }
 0x127   :  { %v179_v27 = vmul.f32 %v178_v18, %v177_v23  ;;  %v99_v28 = vmul.f32 %v98_v19, %v97_v24  ;;  %v297_v18 = vstv %s843_s4  ;;  %s555_s4 = sld [smem:[#allocation2 + $0x35]] }
 0x129   :  { %v180_v33 = vadd.f32 %v179_v27, %v174_v26  ;;  %v100_v34 = vadd.f32 %v99_v28, %v94_v21  ;;  %v328_v21 = vstv %s845_s9 }
 0x12a   :  { %v259_v36 = vpop.permute.xlu1 %258  ;;  %v253_v37 = vpop.permute.xlu0 %252 }
 0x12b   :  { %v186_v12 = vmul.f32 %v185_v29, %v180_v33  ;;  %v106_v39 = vmul.f32 %v105_v30, %v100_v34  ;;  %v255_v40 = vmul.f32 %v254_v31, %v253_v37  ;;  %v261_v43 = vmul.f32 %v260_v35, %v259_v36 }
 0x12d   :  { %v188_v41 = vadd.f32 %v186_v12, %v106_v39  ;;  %v256_v44 = vadd.f32 %v255_v40, %v250_v38  ;;  %v364_v40 = vstv %s853_s10 }
 0x12f   :  { %v262_v46 = vadd.f32 %v261_v43, %v256_v44  ;;  %v361_v44 = vstv %s857_s12 }
 0x131   :  { %v268_v48 = vmul.f32 %v267_v45, %v262_v46  ;;  %v368_v45 = vstv %s859_s13 }
 0x133   :  { %v270_v50 = vadd.f32 %v268_v48, %v188_v41  ;;  %v371_v41 = vstv %s855_s11 }
 0x135   :  { %v277_v52 = vadd.f32 %v276_v49, %v270_v50 }
 0x137   :  { %v819_v54 = vsel %vm26_vm0, %v277_v52, 0.0  ;;  %v391_v52 = vstv %s867_s15 }
 0x138   :  { %v279_v55 = vadd.f32 %v819_v54, %v815_v53  ;;  %v281_v56 = vmax.f32 %v815_v53, %v819_v54 }
 0x13a   :  { %v280_v14 = vmul.f32 0.5, %v279_v55  ;;  %284 = vrot.lane.b32.xlu1 %v281_v56, %s596_s18  ;;  %v345_v61 = vmul.f32 %v344_v58, %v281_v56  ;;  %v352_v62 = vmul.f32 %v351_v60, %v281_v56 }
 0x13c   :  { %282 = vrot.lane.b32.xlu0 %v280_v14, %s596_s18  ;;  %v342_v42 = vmul.f32 %v341_v57, %v280_v14  ;;  %v349_v4 = vmul.f32 %v348_v59, %v280_v14  ;;  %s841_s18 = sld [smem:[#allocation2 + $0x3f]] }
 0x13e   :  { %302 = vrot.lane.b32.xlu1 %v281_v56, %s591_s1  ;;  %v828_v5 = vadd.f32 %v345_v61, %v342_v42  ;;  %v830_v6 = vadd.f32 %v352_v62, %v349_v4  ;;  %v381_v61 = vstv %s869_s17  ;;  %v388_v62 = vstv %s873_s20 }
 0x140   :  { %300 = vrot.lane.b32.xlu0 %v280_v14, %s591_s1  ;;  %s518_s1 = sld [smem:[#allocation2 + $0x38]] }
 0x142   :  { %322 = vrot.lane.b32.xlu1 %v281_v56, %s590_s16  ;;  %v290_v17 = vstv %s841_s18  ;;  %s553_s18 = sld [smem:[#allocation2 + $0x34]] }
 0x144   :  { %320 = vrot.lane.b32.xlu0 %v280_v14, %s590_s16  ;;  %s525_s16 = sld [smem:[#allocation2 + $0x4e]] }
 0x146   :  { %358 = vrot.lane.b32.xlu1 %v281_v56, %s592_s21  ;;  %v287_v9 = vstv %s518_s1 }
 0x148   :  { %356 = vrot.lane.b32.xlu0 %v280_v14, %s592_s21  ;;  %s847_s21 = sld [smem:[#allocation2 + $0x4f]] }
 0x14a   :  { %378 = vrot.lane.b32.xlu1 %v281_v56, %s593_s22  ;;  %v315_v3 = vstv %s525_s16 }
 0x14c   :  { %376 = vrot.lane.b32.xlu0 %v280_v14, %s593_s22  ;;  %s849_s22 = sld [smem:[#allocation2 + $0x3a]] }
 0x14e   :  { %398 = vrot.lane.b32.xlu1 %v281_v56, %s597_s19  ;;  %v335_v22 = vstv %s847_s21 }
 0x150   :  { %396 = vrot.lane.b32.xlu0 %v280_v14, %s597_s19  ;;  %s851_s19 = sld [smem:[#allocation2 + $0x48]] }
 0x152   :  { %v325_v30 = vstv %s849_s22 }
 0x156   :  { %v332_v31 = vstv %s851_s19 }
 0x1ac   :  { %v285_v7 = vpop.permute.xlu1 %284 }
 0x1ad   :  { %v291_v27 = vmul.f32 %v290_v17, %v285_v7  ;;  %v298_v28 = vmul.f32 %v297_v18, %v285_v7  ;;  %v401_v18 = vstv %s879_s24 }
 0x1ae   :  { %v283_v8 = vpop.permute.xlu0 %282 }
 0x1af   :  { %v288_v19 = vmul.f32 %v287_v9, %v283_v8  ;;  %v295_v20 = vmul.f32 %v294_v10, %v283_v8 }
 0x1b0   :  { %v303_v13 = vpop.permute.xlu1 %302 }
 0x1b1   :  { %v309_v23 = vmul.f32 %v308_v11, %v303_v13  ;;  %v316_v24 = vmul.f32 %v315_v3, %v303_v13  ;;  %v292_v34 = vadd.f32 %v291_v27, %v288_v19  ;;  %v299_v35 = vadd.f32 %v298_v28, %v295_v20 }
 0x1b2   :  { %v301_v63 = vpop.permute.xlu0 %300  ;;  %v408_v19 = vstv %s885_s25 }
 0x1b3   :  { %v306_v25 = vmul.f32 %v305_v15, %v301_v63  ;;  %v313_v26 = vmul.f32 %v312_v16, %v301_v63  ;;  %v404_v15 = vstv %s875_s0  ;;  %v411_v16 = vstv %s877_s23 }
 0x1b4   :  { %v323_v29 = vpop.permute.xlu1 %322 }
 0x1b5   :  { %v310_v32 = vadd.f32 %v309_v23, %v306_v25  ;;  %v317_v33 = vadd.f32 %v316_v24, %v313_v26  ;;  %v329_v37 = vmul.f32 %v328_v21, %v323_v29  ;;  %v336_v38 = vmul.f32 %v335_v22, %v323_v29 }
 0x1b6   :  { %v321_v36 = vpop.permute.xlu0 %320 }
 0x1b7   :  { %v326_v12 = vmul.f32 %v325_v30, %v321_v36  ;;  %v333_v39 = vmul.f32 %v332_v31, %v321_v36  ;;  %v318_v46 = vadd.f32 %v310_v32, %v292_v34  ;;  %v319_v47 = vadd.f32 %v317_v33, %v299_v35 }
 0x1b8   :  { %v359_v43 = vpop.permute.xlu1 %358  ;;  %v417_v30 = vstv %s891_s26  ;;  %v426_v31 = vstv %s548_s27 }
 0x1b9   :  { %v330_v48 = vadd.f32 %v329_v37, %v326_v12  ;;  %v337_v49 = vadd.f32 %v336_v38, %v333_v39  ;;  %v365_v59 = vmul.f32 %v364_v40, %v359_v43  ;;  %v372_v60 = vmul.f32 %v371_v41, %v359_v43 }
 0x1ba   :  { %v357_v50 = vpop.permute.xlu0 %356 }
 0x1bb   :  { %v338_v55 = vadd.f32 %v330_v48, %v318_v46  ;;  %v339_v56 = vadd.f32 %v337_v49, %v319_v47  ;;  %v362_v57 = vmul.f32 %v361_v44, %v357_v50  ;;  %v369_v58 = vmul.f32 %v368_v45, %v357_v50 }
 0x1bc   :  { %v379_v14 = vpop.permute.xlu1 %378  ;;  %v438_v46 = vstv %s550_s28  ;;  %v447_v47 = vstv %s552_s30  ;;  %v456_v48 = vstv %s554_s3  ;;  %v441_v50 = vstv %s551_s29 }
 0x1bd   :  { %v354_v42 = vadd.f32 %v828_v5, %v338_v55  ;;  %v355_v4 = vadd.f32 %v830_v6, %v339_v56  ;;  %v366_v7 = vadd.f32 %v365_v59, %v362_v57  ;;  %v373_v8 = vadd.f32 %v372_v60, %v369_v58 }
 0x1be   :  { %v377_v9 = vpop.permute.xlu0 %376  ;;  %v385_v10 = vmul.f32 %v384_v51, %v379_v14  ;;  %v392_v11 = vmul.f32 %v391_v52, %v379_v14  ;;  %v450_v51 = vstv %s553_s18  ;;  %v459_v52 = vstv %s555_s4 }
 0x1bf   :  { %v382_v3 = vmul.f32 %v381_v61, %v377_v9  ;;  %v389_v13 = vmul.f32 %v388_v62, %v377_v9  ;;  %v374_v21 = vadd.f32 %v366_v7, %v354_v42  ;;  %v375_v5 = vadd.f32 %v373_v8, %v355_v4 }
 0x1c0   :  { %v399_v17 = vpop.permute.xlu1 %398 }
 0x1c1   :  { %v386_v20 = vadd.f32 %v385_v10, %v382_v3  ;;  %v393_v63 = vadd.f32 %v392_v11, %v389_v13  ;;  %v405_v6 = vmul.f32 %v404_v15, %v399_v17  ;;  %v412_v23 = vmul.f32 %v411_v16, %v399_v17 }
 0x1c2   :  { %v397_v22 = vpop.permute.xlu0 %396 }
 0x1c3   :  { %v402_v24 = vmul.f32 %v401_v18, %v397_v22  ;;  %v409_v25 = vmul.f32 %v408_v19, %v397_v22  ;;  %v394_v26 = vadd.f32 %v386_v20, %v374_v21  ;;  %v395_v27 = vadd.f32 %v393_v63, %v375_v5 }
 0x1c5   :  { %v406_v28 = vadd.f32 %v405_v6, %v402_v24  ;;  %v413_v29 = vadd.f32 %v412_v23, %v409_v25 }
 0x1c7   :  { %v414_v32 = vadd.f32 %v406_v28, %v394_v26  ;;  %v415_v33 = vadd.f32 %v413_v29, %v395_v27 }
 0x1c9   :  { %v418_v34 = vadd.f32 %v417_v30, %v414_v32  ;;  %v427_v35 = vadd.f32 %v426_v31, %v415_v33 }
 0x1cb   :  { %v547_v36 = vmul.f32 -1.442695, %v418_v34  ;;  %v549_v37 = vmul.f32 -1.442695, %v427_v35 }
 0x1cd   :  { %567 = vpow2.f32 %v547_v36 }
 0x1ce   :  { %569 = vpow2.f32 %v549_v37 }
 0x1da   :  { %v568_v38 = vpop.eup %567 }
 0x1db   :  { %v570_v12 = vpop.eup %569  ;;  %v422_v39 = vadd.f32 1.0, %v568_v38 }
 0x1dc   :  { %v431_v40 = vadd.f32 1.0, %v570_v12 }
 0x1dd   :  { %571 = vrcp.f32 %v422_v39 }
 0x1de   :  { %573 = vrcp.f32 %v431_v40 }
 0x1ea   :  { %v572_v41 = vpop.eup %571 }
 0x1eb   :  { %v574_v43 = vpop.eup %573  ;;  %v434_v44 = vmul.f32 %v572_v41, %v815_v53 }
 0x1ec   :  { %v435_v45 = vmul.f32 %v574_v43, %v819_v54 }
 0x1ee   :  { %v436_v49 = vadd.f32 %v435_v45, %v434_v44 }
 0x1f0   :  { %v439_v55 = vmul.f32 %v438_v46, %v436_v49  ;;  %v448_v56 = vmul.f32 %v447_v47, %v436_v49  ;;  %v457_v57 = vmul.f32 %v456_v48, %v436_v49 }
 0x1f2   :  { %v442_v58 = vadd.f32 %v441_v50, %v439_v55  ;;  %v451_v59 = vadd.f32 %v450_v51, %v448_v56  ;;  %v460_v60 = vadd.f32 %v459_v52, %v457_v57 }
 0x1f4   :  { %v443_v14 = vadd.f32 1.0, %v442_v58  ;;  %v452_v61 = vadd.f32 1.0, %v451_v59  ;;  %v461_v62 = vadd.f32 1.0, %v460_v60 }
 0x1f6   :  { %v444_v53 = vmul.f32 %v443_v14, %v621_v0  ;;  %v453_v54 = vmul.f32 %v452_v61, %v630_v1  ;;  %v462_v42 = vmul.f32 %v461_v62, %v639_v2 }
 0x1f8   :  { %445 = vst [vmem:[%s916_s2] sm:$0xff] %v444_v53  ;;  %454 = vst [vmem:[%s916_s2 + $0x8] sm:$0xff] %v453_v54 }
 0x1f9   :  { %463 = vst [vmem:[%s916_s2 + $0x10] sm:$0xff] %v462_v42 }
 0x1fa   :  { %468 = vsyncpa [#allocation3], 1 }

</bundles_post_ra>
